<compile_context>
chip_gen: v7x
topology: tpu7x:2x2x1
jax: 0.10.0
libtpu: 0.0.40
codegen_flags: <defaults>
</compile_context>

<pallas_src>
import functools

import jax
import jax.numpy as jnp
from jax.experimental import pallas as pl
from jax.experimental.pallas import tpu as pltpu

EPSILON = 1e-10


def _kappa_stats_kernel(y_pred_ref, y_true_ref, conf_ref, hist_ref, *,
                        num_classes, batch_size, tile_b, tiles_per_slice,
                        y_pow, epsilon, need_mask, use_mxu):
    """Accumulate per-slice confusion matrix + label histogram over batch tiles.

    conf_ref : (1, C, C) f32  partial  sum_i pred_norm[:, i] (outer) onehot[i, :]
    hist_ref : (1, C, 1) f32  partial  per-class label counts
    """
    C = num_classes
    t = pl.program_id(1)

    @pl.when(t == 0)
    def _init():
        conf_ref[...] = jnp.zeros_like(conf_ref)
        hist_ref[...] = jnp.zeros_like(hist_ref)

    logits = y_pred_ref[...].astype(jnp.float32)          # (C, TB) lane-dense
    labels = y_true_ref[...]                               # (1, TB) int32
    tb = logits.shape[1]

    valid = None
    if need_mask:
        # Global column index of every lane; anything >= batch_size is either
        # the ragged tail of the last real tile or a duplicated (clamped) tile
        # and must not contribute.
        start = (pl.program_id(0) * tiles_per_slice + t) * tile_b
        gcol = start + jax.lax.broadcasted_iota(jnp.int32, (1, tb), 1)
        valid = gcol < batch_size                          # (1, TB) bool
        # Zero padded lanes *before* exp: stale VMEM can hold NaN/Inf and
        # NaN * 0 inside the masked sums would poison the accumulators.
        logits = jnp.where(valid, logits, 0.0)

    # Fused softmax + pow + renormalisation:
    #   pred_norm = e^p / (eps*S^p + sum(e^p)),  e = exp(x - max), S = sum(e)
    # (== softmax**p / (eps + sum(softmax**p)) up to the eps scaling, ~1e-9 rel)
    m = jnp.max(logits, axis=0, keepdims=True)             # (1, TB) sublane reduce
    e = jnp.exp(logits - m)                                 # (C, TB) EUP
    p = e * e if y_pow == 2 else e
    s = jnp.sum(p, axis=0, keepdims=True) + epsilon         # (1, TB)
    inv = pl.reciprocal(s, approx=True)                     # EUP slot
    inv = inv * (2.0 - s * inv)                              # Newton steps -> ~f32
    inv = inv * (2.0 - s * inv)
    pred_norm = p * inv                                      # (C, TB)

    if use_mxu:
        rows = jax.lax.broadcasted_iota(jnp.int32, (C, tb), 0)
        hit = rows == labels                                 # (C, TB) one-hot mask
        if valid is not None:
            hit = jnp.logical_and(hit, valid)
        onehot = hit.astype(jnp.bfloat16)                    # 0/1: exact in bf16
        # hi/lo split keeps ~f32 accuracy through the bf16 MXU.
        hi = pred_norm.astype(jnp.bfloat16)
        lo = (pred_norm - hi.astype(jnp.float32)).astype(jnp.bfloat16)
        dn = (((1,), (1,)), ((), ()))                        # contract batch (lane) axes
        conf = jax.lax.dot_general(hi, onehot, dn,
                                   preferred_element_type=jnp.float32)
        conf = conf + jax.lax.dot_general(lo, onehot, dn,
                                          preferred_element_type=jnp.float32)
        hist = jnp.sum(jnp.where(hit, 1.0, 0.0), axis=1, keepdims=True)  # (C, 1)
    else:
        # Small C: masked VPU multiplies + XLU lane reductions, assembled into
        # ONE wide accumulate per step (no per-column RMW of the accumulator).
        conf = jnp.zeros((C, C), jnp.float32)
        hist = jnp.zeros((C, 1), jnp.float32)
        lane = jax.lax.broadcasted_iota(jnp.int32, (1, C), 1)
        row = jax.lax.broadcasted_iota(jnp.int32, (C, 1), 0)
        for j in range(C):
            hit = labels == j
            if valid is not None:
                hit = jnp.logical_and(hit, valid)
            mj = hit.astype(jnp.float32)                     # (1, TB)
            sel = (lane == j).astype(jnp.float32)            # (1, C) column selector
            selc = (row == j).astype(jnp.float32)            # (C, 1) row selector
            conf = conf + jnp.sum(pred_norm * mj, axis=1, keepdims=True) * sel
            hist = hist + jnp.sum(mj, axis=1, keepdims=True) * selc

    conf_ref[...] += conf[None]
    hist_ref[...] += hist[None]


def _tile_and_vmem(num_classes, dtype_size):
    """Pick a batch tile (multiple of 128) from a per-generation VMEM budget."""
    try:
        kind = jax.devices()[0].device_kind.lower()
    except Exception:
        kind = ""
    if "v5" in kind or "v6" in kind:            # 128 MiB VMEM parts
        budget, vmem_limit = 56 << 20, 100 << 20
    elif "v7" in kind:                          # 64 MiB VMEM -> stay well under
        budget, vmem_limit = 26 << 20, 48 << 20
    else:                                       # unknown / older: default limits
        budget, vmem_limit = 12 << 20, None
    cp = ((num_classes + 7) // 8) * 8           # sublane-padded class dim
    # 2 double-buffered logits tiles + 2 label tiles + ~6 live (C, tb) f32 temps
    per_lane = 2 * cp * dtype_size + 2 * 8 * 4 + 6 * cp * 4
    tb = max(512, (budget // per_lane) // 128 * 128)
    return min(tb, 128 * 1024), vmem_limit


def weighted_kappa_loss(y_pred, y_true, num_classes, mode='quadratic',
                        epsilon=EPSILON, block_b=None, num_core_splits=2):
    """Forward pass of WeightedKappaLoss (loss_type='kappa').

    y_pred: [B, C] logits (any float dtype); y_true: [B] int labels in [0, C).
    """
    B, C = y_pred.shape
    assert C == num_classes
    y_pow = 2 if mode == 'quadratic' else 1

    # Lane-dense layout: classes on sublanes, batch on the 128-wide lane axis.
    # TODO(synk): fold this relayout into the kernel to save one HBM pass.
    y_pred_t = jnp.transpose(y_pred)                          # (C, B)
    labels = y_true.astype(jnp.int32).reshape(1, B)           # (1, B)

    auto_tb, vmem_limit = _tile_and_vmem(C, y_pred.dtype.itemsize)
    if block_b is None:
        tb = auto_tb
    else:
        tb = int(block_b)
        if B > tb:
            assert tb % 128 == 0, "block_b must be a multiple of 128 when B > block_b"
    if B <= tb:
        tb = B                                                 # single full-extent tile
    n_tiles = -(-B // tb)
    n_slices = max(1, min(int(num_core_splits), n_tiles))      # v7x: 2 TensorCores
    tiles_per_slice = -(-n_tiles // n_slices)
    need_mask = (n_slices * tiles_per_slice * tb) != B
    use_mxu = C >= 8

    kernel = functools.partial(
        _kappa_stats_kernel, num_classes=C, batch_size=B, tile_b=tb,
        tiles_per_slice=tiles_per_slice, y_pow=y_pow, epsilon=epsilon,
        need_mask=need_mask, use_mxu=use_mxu)

    def _in_map(s, t):
        # Clamp so the (possibly duplicated) overflow tiles of the last slice
        # stay in bounds; their lanes are masked out inside the kernel.
        return (0, jnp.minimum(s * tiles_per_slice + t, n_tiles - 1))

    grid_spec = pltpu.PrefetchScalarGridSpec(
        num_scalar_prefetch=0,
        grid=(n_slices, tiles_per_slice),
        in_specs=[
            pl.BlockSpec((C, tb), _in_map),                    # logits tile
            pl.BlockSpec((1, tb), _in_map),                    # label tile
        ],
        out_specs=[
            pl.BlockSpec((1, C, C), lambda s, t: (s, 0, 0)),   # partial conf mat
            pl.BlockSpec((1, C, 1), lambda s, t: (s, 0, 0)),   # partial label hist
        ],
    )

    conf_parts, hist_parts = pl.pallas_call(
        kernel,
        out_shape=(jax.ShapeDtypeStruct((n_slices, C, C), jnp.float32),
                   jax.ShapeDtypeStruct((n_slices, C, 1), jnp.float32)),
        grid_spec=grid_spec,
        compiler_params=pltpu.CompilerParams(
            dimension_semantics=("parallel", "arbitrary"),
            vmem_limit_bytes=vmem_limit),
        cost_estimate=pl.CostEstimate(
            flops=int(B * C * (2 * C + 12)),
            transcendentals=int(B * C + B),
            bytes_accessed=int(B * C * y_pred.dtype.itemsize + B * 4
                               + n_slices * (C * C + C) * 4)),
    )(y_pred_t, labels)

    # Tiny O(C^2) kappa epilogue (weights / nom / denom) in plain JAX.
    conf = jnp.sum(conf_parts, axis=0)                         # (C, C)
    hist_b = jnp.sum(hist_parts, axis=0)[:, 0]                 # (C,)
    # hist_a == row-sums of conf because every (valid) sample has exactly one label.
    hist_a = jnp.sum(conf, axis=1)                             # (C,)
    idx = jnp.arange(C, dtype=jnp.float32)
    w = jnp.square(idx[:, None] - idx[None, :]) * (1.0 / float((C - 1) ** 2))
    nom = jnp.sum(w * conf)
    denom = jnp.sum(w * (hist_a[:, None] * hist_b[None, :])) * (1.0 / float(B))
    return nom / (denom + epsilon)


def _reference(y_pred, y_true, num_classes, mode='quadratic', epsilon=EPSILON):
    """Pure-JAX mirror of the PyTorch kappa_loss."""
    y_pow = 2 if mode == 'quadratic' else 1
    idx = jnp.arange(num_classes, dtype=jnp.float32)
    rep = jnp.tile(idx[:, None], (1, num_classes))
    weights = jnp.square(rep - rep.T) / float((num_classes - 1) ** 2)
    y_true_oh = jax.nn.one_hot(y_true, num_classes, dtype=jnp.float32)
    sm = jax.nn.softmax(y_pred.astype(jnp.float32), axis=1)
    pred_ = sm ** y_pow
    pred_norm = pred_ / (epsilon + jnp.sum(pred_, axis=1, keepdims=True))
    hist_a = jnp.sum(pred_norm, axis=0)
    hist_b = jnp.sum(y_true_oh, axis=0)
    conf_mat = pred_norm.T @ y_true_oh
    bsize = y_pred.shape[0]
    nom = jnp.sum(weights * conf_mat)
    expected = jnp.outer(hist_a, hist_b)
    denom = jnp.sum(weights * expected / bsize)
    return nom / (denom + epsilon)


if __name__ == "__main__":
    key = jax.random.PRNGKey(0)
    ks = jax.random.split(key, 6)

    # 1) Small single-tile case (masked-VPU path), shapes matching the module.
    C1, B1 = 4, 8
    yp1 = jax.random.normal(ks[0], (B1, C1), dtype=jnp.float32)
    yt1 = jax.random.randint(ks[1], (B1,), 0, C1, dtype=jnp.int32)
    out1 = jax.block_until_ready(weighted_kappa_loss(yp1, yt1, C1))
    ref1 = _reference(yp1, yt1, C1)
    assert jnp.allclose(out1, ref1, rtol=3e-4, atol=1e-6), (out1, ref1)

    # 2) Multi-tile grid, ragged tail, 2-slice split (VPU path, in-kernel mask).
    C2, B2 = 6, 300
    yp2 = jax.random.normal(ks[2], (B2, C2), dtype=jnp.float32)
    yt2 = jax.random.randint(ks[3], (B2,), 0, C2, dtype=jnp.int32)
    out2 = jax.block_until_ready(weighted_kappa_loss(yp2, yt2, C2, block_b=128))
    ref2 = _reference(yp2, yt2, C2)
    assert jnp.allclose(out2, ref2, rtol=3e-4, atol=1e-6), (out2, ref2)

    # 3) MXU path (C >= 8) with hi/lo bf16 split, ragged tail, linear mode.
    C3, B3 = 16, 200
    yp3 = jax.random.normal(ks[4], (B3, C3), dtype=jnp.float32)
    yt3 = jax.random.randint(ks[5], (B3,), 0, C3, dtype=jnp.int32)
    out3 = jax.block_until_ready(
        weighted_kappa_loss(yp3, yt3, C3, mode='linear', block_b=128))
    ref3 = _reference(yp3, yt3, C3, mode='linear')
    assert jnp.allclose(out3, ref3, rtol=1e-3, atol=1e-6), (out3, ref3)

    print("KERNEL_OK")
</pallas_src>

<mosaic_0001>
module attributes {stable_mosaic.version = 11 : i64} {
  func.func @_kappa_stats_kernel(%arg0: i32, %arg1: i32, %arg2: memref<4x8xf32, #tpu.memory_space<vmem>>, %arg3: memref<1x8xi32, #tpu.memory_space<vmem>>, %arg4: memref<1x4x4xf32, #tpu.memory_space<vmem>>, %arg5: memref<1x4x1xf32, #tpu.memory_space<vmem>>) attributes {dimension_semantics = [#tpu.dimension_semantics<parallel>, #tpu.dimension_semantics<arbitrary>], iteration_bounds = array<i64: 1, 1>, scalar_prefetch = 0 : i64, scratch_operands = 0 : i64, tpu.core_type = #tpu.core_type<tc>, window_params = [{transform_indices = @transform_0, window_bounds = array<i64: 4, 8>}, {transform_indices = @transform_1, window_bounds = array<i64: 1, 8>}, {transform_indices = @transform_2, window_bounds = array<i64: 1, 4, 4>}, {transform_indices = @transform_3, window_bounds = array<i64: 1, 4, 1>}]} {
    %c0_i32 = arith.constant 0 : i32
    %0 = arith.cmpi eq, %arg1, %c0_i32 : i32
    %1 = arith.extui %0 : i1 to i32
    %c0_i32_0 = arith.constant 0 : i32
    %2 = arith.cmpi ne, %1, %c0_i32_0 : i32
    scf.if %2 {
      %cst_39 = arith.constant 0.000000e+00 : f32
      %138 = vector.broadcast %cst_39 : f32 to vector<1x4x4xf32>
      %c0_40 = arith.constant 0 : index
      %c0_41 = arith.constant 0 : index
      %c0_42 = arith.constant 0 : index
      %139 = vector.load %arg4[%c0_40, %c0_41, %c0_42] : memref<1x4x4xf32, #tpu.memory_space<vmem>>, vector<1x4x4xf32>
      tpu.vector_store %arg4[%c0_40, %c0_41, %c0_42], %138 {strides = array<i32>} : memref<1x4x4xf32, #tpu.memory_space<vmem>>, vector<1x4x4xf32>,
      %cst_43 = arith.constant 0.000000e+00 : f32
      %140 = vector.broadcast %cst_43 : f32 to vector<1x4x1xf32>
      %c0_44 = arith.constant 0 : index
      %c0_45 = arith.constant 0 : index
      %c0_46 = arith.constant 0 : index
      %141 = vector.load %arg5[%c0_44, %c0_45, %c0_46] : memref<1x4x1xf32, #tpu.memory_space<vmem>>, vector<1x4x1xf32>
      tpu.vector_store %arg5[%c0_44, %c0_45, %c0_46], %140 {strides = array<i32>} : memref<1x4x1xf32, #tpu.memory_space<vmem>>, vector<1x4x1xf32>,
    } else {
    }
    %c0 = arith.constant 0 : index
    %c0_1 = arith.constant 0 : index
    %3 = vector.load %arg2[%c0, %c0_1] : memref<4x8xf32, #tpu.memory_space<vmem>>, vector<4x8xf32>
    %c0_2 = arith.constant 0 : index
    %c0_3 = arith.constant 0 : index
    %4 = vector.load %arg3[%c0_2, %c0_3] : memref<1x8xi32, #tpu.memory_space<vmem>>, vector<1x8xi32>
    %cst = arith.constant dense<0xFF800000> : vector<8xf32>
    %5 = vector.multi_reduction <maximumf>, %3, %cst [0] : vector<4x8xf32> to vector<8xf32>
    %6 = vector.shape_cast %5 : vector<8xf32> to vector<1x8xf32>
    %7 = vector.broadcast %6 : vector<1x8xf32> to vector<4x8xf32>
    %8 = arith.subf %3, %7 : vector<4x8xf32>
    %9 = math.exp %8 : vector<4x8xf32>
    %10 = arith.mulf %9, %9 : vector<4x8xf32>
    %cst_4 = arith.constant dense<0.000000e+00> : vector<8xf32>
    %11 = vector.multi_reduction <add>, %10, %cst_4 [0] : vector<4x8xf32> to vector<8xf32>
    %12 = vector.shape_cast %11 : vector<8xf32> to vector<1x8xf32>
    %cst_5 = arith.constant 1.000000e-10 : f32
    %13 = vector.broadcast %cst_5 : f32 to vector<1x8xf32>
    %14 = arith.addf %12, %13 : vector<1x8xf32>
    %15 = tpu.reciprocal %14 {approx = true} : vector<1x8xf32> -> vector<1x8xf32>
    %16 = arith.mulf %14, %15 : vector<1x8xf32>
    %cst_6 = arith.constant 2.000000e+00 : f32
    %17 = vector.broadcast %cst_6 : f32 to vector<1x8xf32>
    %18 = arith.subf %17, %16 : vector<1x8xf32>
    %19 = arith.mulf %15, %18 : vector<1x8xf32>
    %20 = arith.mulf %14, %19 : vector<1x8xf32>
    %cst_7 = arith.constant 2.000000e+00 : f32
    %21 = vector.broadcast %cst_7 : f32 to vector<1x8xf32>
    %22 = arith.subf %21, %20 : vector<1x8xf32>
    %23 = arith.mulf %19, %22 : vector<1x8xf32>
    %24 = vector.broadcast %23 : vector<1x8xf32> to vector<4x8xf32>
    %25 = arith.mulf %10, %24 : vector<4x8xf32>
    %cst_8 = arith.constant 0.000000e+00 : f32
    %26 = vector.broadcast %cst_8 : f32 to vector<4x4xf32>
    %cst_9 = arith.constant 0.000000e+00 : f32
    %27 = vector.broadcast %cst_9 : f32 to vector<4x1xf32>
    %28 = tpu.iota {dimensions = array<i32: 1>} : vector<1x4xi32>
    %29 = tpu.iota {dimensions = array<i32: 0>} : vector<4x1xi32>
    %c0_i32_10 = arith.constant 0 : i32
    %30 = vector.broadcast %c0_i32_10 : i32 to vector<1x8xi32>
    %31 = arith.cmpi eq, %4, %30 : vector<1x8xi32>
    %32 = arith.extui %31 : vector<1x8xi1> to vector<1x8xi32>
    %33 = arith.sitofp %32 : vector<1x8xi32> to vector<1x8xf32>
    %c0_i32_11 = arith.constant 0 : i32
    %34 = vector.broadcast %c0_i32_11 : i32 to vector<1x4xi32>
    %35 = arith.cmpi eq, %28, %34 : vector<1x4xi32>
    %36 = arith.extui %35 : vector<1x4xi1> to vector<1x4xi32>
    %37 = arith.sitofp %36 : vector<1x4xi32> to vector<1x4xf32>
    %c0_i32_12 = arith.constant 0 : i32
    %38 = vector.broadcast %c0_i32_12 : i32 to vector<4x1xi32>
    %39 = arith.cmpi eq, %29, %38 : vector<4x1xi32>
    %40 = arith.extui %39 : vector<4x1xi1> to vector<4x1xi32>
    %41 = arith.sitofp %40 : vector<4x1xi32> to vector<4x1xf32>
    %42 = vector.broadcast %33 : vector<1x8xf32> to vector<4x8xf32>
    %43 = arith.mulf %25, %42 : vector<4x8xf32>
    %cst_13 = arith.constant dense<0.000000e+00> : vector<4xf32>
    %44 = vector.multi_reduction <add>, %43, %cst_13 [1] : vector<4x8xf32> to vector<4xf32>
    %45 = vector.shape_cast %44 : vector<4xf32> to vector<4x1xf32>
    %46 = vector.broadcast %45 : vector<4x1xf32> to vector<4x4xf32>
    %47 = vector.broadcast %37 : vector<1x4xf32> to vector<4x4xf32>
    %48 = arith.mulf %46, %47 : vector<4x4xf32>
    %49 = arith.addf %26, %48 : vector<4x4xf32>
    %cst_14 = arith.constant dense<0.000000e+00> : vector<1xf32>
    %50 = vector.multi_reduction <add>, %33, %cst_14 [1] : vector<1x8xf32> to vector<1xf32>
    %51 = vector.shape_cast %50 : vector<1xf32> to vector<1x1xf32>
    %52 = vector.broadcast %51 : vector<1x1xf32> to vector<4x1xf32>
    %53 = arith.mulf %52, %41 : vector<4x1xf32>
    %54 = arith.addf %27, %53 : vector<4x1xf32>
    %c1_i32 = arith.constant 1 : i32
    %55 = vector.broadcast %c1_i32 : i32 to vector<1x8xi32>
    %56 = arith.cmpi eq, %4, %55 : vector<1x8xi32>
    %57 = arith.extui %56 : vector<1x8xi1> to vector<1x8xi32>
    %58 = arith.sitofp %57 : vector<1x8xi32> to vector<1x8xf32>
    %c1_i32_15 = arith.constant 1 : i32
    %59 = vector.broadcast %c1_i32_15 : i32 to vector<1x4xi32>
    %60 = arith.cmpi eq, %28, %59 : vector<1x4xi32>
    %61 = arith.extui %60 : vector<1x4xi1> to vector<1x4xi32>
    %62 = arith.sitofp %61 : vector<1x4xi32> to vector<1x4xf32>
    %c1_i32_16 = arith.constant 1 : i32
    %63 = vector.broadcast %c1_i32_16 : i32 to vector<4x1xi32>
    %64 = arith.cmpi eq, %29, %63 : vector<4x1xi32>
    %65 = arith.extui %64 : vector<4x1xi1> to vector<4x1xi32>
    %66 = arith.sitofp %65 : vector<4x1xi32> to vector<4x1xf32>
    %67 = vector.broadcast %58 : vector<1x8xf32> to vector<4x8xf32>
    %68 = arith.mulf %25, %67 : vector<4x8xf32>
    %cst_17 = arith.constant dense<0.000000e+00> : vector<4xf32>
    %69 = vector.multi_reduction <add>, %68, %cst_17 [1] : vector<4x8xf32> to vector<4xf32>
    %70 = vector.shape_cast %69 : vector<4xf32> to vector<4x1xf32>
    %71 = vector.broadcast %70 : vector<4x1xf32> to vector<4x4xf32>
    %72 = vector.broadcast %62 : vector<1x4xf32> to vector<4x4xf32>
    %73 = arith.mulf %71, %72 : vector<4x4xf32>
    %74 = arith.addf %49, %73 : vector<4x4xf32>
    %cst_18 = arith.constant dense<0.000000e+00> : vector<1xf32>
    %75 = vector.multi_reduction <add>, %58, %cst_18 [1] : vector<1x8xf32> to vector<1xf32>
    %76 = vector.shape_cast %75 : vector<1xf32> to vector<1x1xf32>
    %77 = vector.broadcast %76 : vector<1x1xf32> to vector<4x1xf32>
    %78 = arith.mulf %77, %66 : vector<4x1xf32>
    %79 = arith.addf %54, %78 : vector<4x1xf32>
    %c2_i32 = arith.constant 2 : i32
    %80 = vector.broadcast %c2_i32 : i32 to vector<1x8xi32>
    %81 = arith.cmpi eq, %4, %80 : vector<1x8xi32>
    %82 = arith.extui %81 : vector<1x8xi1> to vector<1x8xi32>
    %83 = arith.sitofp %82 : vector<1x8xi32> to vector<1x8xf32>
    %c2_i32_19 = arith.constant 2 : i32
    %84 = vector.broadcast %c2_i32_19 : i32 to vector<1x4xi32>
    %85 = arith.cmpi eq, %28, %84 : vector<1x4xi32>
    %86 = arith.extui %85 : vector<1x4xi1> to vector<1x4xi32>
    %87 = arith.sitofp %86 : vector<1x4xi32> to vector<1x4xf32>
    %c2_i32_20 = arith.constant 2 : i32
    %88 = vector.broadcast %c2_i32_20 : i32 to vector<4x1xi32>
    %89 = arith.cmpi eq, %29, %88 : vector<4x1xi32>
    %90 = arith.extui %89 : vector<4x1xi1> to vector<4x1xi32>
    %91 = arith.sitofp %90 : vector<4x1xi32> to vector<4x1xf32>
    %92 = vector.broadcast %83 : vector<1x8xf32> to vector<4x8xf32>
    %93 = arith.mulf %25, %92 : vector<4x8xf32>
    %cst_21 = arith.constant dense<0.000000e+00> : vector<4xf32>
    %94 = vector.multi_reduction <add>, %93, %cst_21 [1] : vector<4x8xf32> to vector<4xf32>
    %95 = vector.shape_cast %94 : vector<4xf32> to vector<4x1xf32>
    %96 = vector.broadcast %95 : vector<4x1xf32> to vector<4x4xf32>
    %97 = vector.broadcast %87 : vector<1x4xf32> to vector<4x4xf32>
    %98 = arith.mulf %96, %97 : vector<4x4xf32>
    %99 = arith.addf %74, %98 : vector<4x4xf32>
    %cst_22 = arith.constant dense<0.000000e+00> : vector<1xf32>
    %100 = vector.multi_reduction <add>, %83, %cst_22 [1] : vector<1x8xf32> to vector<1xf32>
    %101 = vector.shape_cast %100 : vector<1xf32> to vector<1x1xf32>
    %102 = vector.broadcast %101 : vector<1x1xf32> to vector<4x1xf32>
    %103 = arith.mulf %102, %91 : vector<4x1xf32>
    %104 = arith.addf %79, %103 : vector<4x1xf32>
    %c3_i32 = arith.constant 3 : i32
    %105 = vector.broadcast %c3_i32 : i32 to vector<1x8xi32>
    %106 = arith.cmpi eq, %4, %105 : vector<1x8xi32>
    %107 = arith.extui %106 : vector<1x8xi1> to vector<1x8xi32>
    %108 = arith.sitofp %107 : vector<1x8xi32> to vector<1x8xf32>
    %c3_i32_23 = arith.constant 3 : i32
    %109 = vector.broadcast %c3_i32_23 : i32 to vector<1x4xi32>
    %110 = arith.cmpi eq, %28, %109 : vector<1x4xi32>
    %111 = arith.extui %110 : vector<1x4xi1> to vector<1x4xi32>
    %112 = arith.sitofp %111 : vector<1x4xi32> to vector<1x4xf32>
    %c3_i32_24 = arith.constant 3 : i32
    %113 = vector.broadcast %c3_i32_24 : i32 to vector<4x1xi32>
    %114 = arith.cmpi eq, %29, %113 : vector<4x1xi32>
    %115 = arith.extui %114 : vector<4x1xi1> to vector<4x1xi32>
    %116 = arith.sitofp %115 : vector<4x1xi32> to vector<4x1xf32>
    %117 = vector.broadcast %108 : vector<1x8xf32> to vector<4x8xf32>
    %118 = arith.mulf %25, %117 : vector<4x8xf32>
    %cst_25 = arith.constant dense<0.000000e+00> : vector<4xf32>
    %119 = vector.multi_reduction <add>, %118, %cst_25 [1] : vector<4x8xf32> to vector<4xf32>
    %120 = vector.shape_cast %119 : vector<4xf32> to vector<4x1xf32>
    %121 = vector.broadcast %120 : vector<4x1xf32> to vector<4x4xf32>
    %122 = vector.broadcast %112 : vector<1x4xf32> to vector<4x4xf32>
    %123 = arith.mulf %121, %122 : vector<4x4xf32>
    %124 = arith.addf %99, %123 : vector<4x4xf32>
    %cst_26 = arith.constant dense<0.000000e+00> : vector<1xf32>
    %125 = vector.multi_reduction <add>, %108, %cst_26 [1] : vector<1x8xf32> to vector<1xf32>
    %126 = vector.shape_cast %125 : vector<1xf32> to vector<1x1xf32>
    %127 = vector.broadcast %126 : vector<1x1xf32> to vector<4x1xf32>
    %128 = arith.mulf %127, %116 : vector<4x1xf32>
    %129 = arith.addf %104, %128 : vector<4x1xf32>
    %c0_27 = arith.constant 0 : index
    %c0_28 = arith.constant 0 : index
    %c0_29 = arith.constant 0 : index
    %130 = vector.load %arg4[%c0_27, %c0_28, %c0_29] : memref<1x4x4xf32, #tpu.memory_space<vmem>>, vector<1x4x4xf32>
    %131 = vector.shape_cast %124 : vector<4x4xf32> to vector<1x4x4xf32>
    %132 = arith.addf %130, %131 : vector<1x4x4xf32>
    %c0_30 = arith.constant 0 : index
    %c0_31 = arith.constant 0 : index
    %c0_32 = arith.constant 0 : index
    %133 = vector.load %arg4[%c0_30, %c0_31, %c0_32] : memref<1x4x4xf32, #tpu.memory_space<vmem>>, vector<1x4x4xf32>
    tpu.vector_store %arg4[%c0_30, %c0_31, %c0_32], %132 {strides = array<i32>} : memref<1x4x4xf32, #tpu.memory_space<vmem>>, vector<1x4x4xf32>,
    %c0_33 = arith.constant 0 : index
    %c0_34 = arith.constant 0 : index
    %c0_35 = arith.constant 0 : index
    %134 = vector.load %arg5[%c0_33, %c0_34, %c0_35] : memref<1x4x1xf32, #tpu.memory_space<vmem>>, vector<1x4x1xf32>
    %135 = vector.shape_cast %129 : vector<4x1xf32> to vector<1x4x1xf32>
    %136 = arith.addf %134, %135 : vector<1x4x1xf32>
    %c0_36 = arith.constant 0 : index
    %c0_37 = arith.constant 0 : index
    %c0_38 = arith.constant 0 : index
    %137 = vector.load %arg5[%c0_36, %c0_37, %c0_38] : memref<1x4x1xf32, #tpu.memory_space<vmem>>, vector<1x4x1xf32>
    tpu.vector_store %arg5[%c0_36, %c0_37, %c0_38], %136 {strides = array<i32>} : memref<1x4x1xf32, #tpu.memory_space<vmem>>, vector<1x4x1xf32>,
    return
  }
  func.func @transform_0(%arg0: i32, %arg1: i32) -> (i32, i32) {
    %c1_i32 = arith.constant 1 : i32
    %0 = arith.muli %arg0, %c1_i32 : i32
    %1 = arith.addi %0, %arg1 : i32
    %c0_i32 = arith.constant 0 : i32
    %2 = arith.minsi %1, %c0_i32 : i32
    %c0_i32_0 = arith.constant 0 : i32
    %c0_i32_1 = arith.constant 0 : i32
    return %c0_i32_0, %2 : i32, i32
  }
  func.func @transform_1(%arg0: i32, %arg1: i32) -> (i32, i32) {
    %c1_i32 = arith.constant 1 : i32
    %0 = arith.muli %arg0, %c1_i32 : i32
    %1 = arith.addi %0, %arg1 : i32
    %c0_i32 = arith.constant 0 : i32
    %2 = arith.minsi %1, %c0_i32 : i32
    %c0_i32_0 = arith.constant 0 : i32
    %c0_i32_1 = arith.constant 0 : i32
    return %c0_i32_0, %2 : i32, i32
  }
  func.func @transform_2(%arg0: i32, %arg1: i32) -> (i32, i32, i32) {
    %c0_i32 = arith.constant 0 : i32
    %c0_i32_0 = arith.constant 0 : i32
    %c0_i32_1 = arith.constant 0 : i32
    return %arg0, %c0_i32, %c0_i32_0 : i32, i32, i32
  }
  func.func @transform_3(%arg0: i32, %arg1: i32) -> (i32, i32, i32) {
    %c0_i32 = arith.constant 0 : i32
    %c0_i32_0 = arith.constant 0 : i32
    %c0_i32_1 = arith.constant 0 : i32
    return %arg0, %c0_i32, %c0_i32_0 : i32, i32, i32
  }
}

</mosaic_0001>

<bundles_post_ra>
// kernel: tpu_custom_call.1
= control target key start
LH: loop header
LB: loop body
LE: loop exit
PB: predicated region body
PF: predicated region fallthrough
CT: control target
= control target key end

     0   :  { %9 = vsyncpa [#allocation3], 0  ;;  %s407_s0 = inlined_call_operand.hbm [shape: f32[4,8], index: 0, kind: input, shape index: {}]   ;;  %s408_s1 = inlined_call_operand.vmem [shape: s32[1,8], index: 1, kind: input, shape index: {}]   ;;  %s409_s2 = inlined_call_operand.hbm [shape: f32[1,4,4], index: 2, kind: output, shape index: {0}]   ;;  %s410_s3 = inlined_call_operand.vmem [shape: f32[1,4,1], index: 3, kind: output, shape index: {1}]  }
   0x1   :  { %10 = vsyncpa [#allocation4], 0  ;;  %s320_s12 = smov [#allocation2]   ;;  %s272_s16 = scalar_lea.hbm %s407_s0, 64 }
   0x2   :  { %s22_s13 = sshll.u32 %s320_s12, 4  ;;  %p273_p0 = scmp.ne.s32.totalorder %s407_s0, %s272_s16  ;;  %s23_s13 = int_to_ptr.vmem [resolvable:$true] %s22_s13 }
   0x3   :  { %p276_p1 = scmp.lt.u32.totalorder %s272_s16, %s407_s0 }
   0x5   :  { %p278_p2 = pnand %p276_p1, %p273_p0 }
   0x7   :  { %281 = shalt.err (!%p278_p2)
}
   0x8   :  { %s282_s21 = scalar_lea.vmem %s23_s13, 64  ;;  %p287_p4 = scmp.lt.s32.totalorder %s23_s13, %s23_s13 }
   0x9   :  { %p283_p3 = scmp.ne.s32.totalorder %s23_s13, %s282_s21  ;;  %p288_p5 = scmp.lt.s32.totalorder %s282_s21, %s282_s21 }
   0xb   :  { %p289_p6 = por %p288_p5, %p287_p4 }
   0xd   :  { %p290_p7 = pnand %p289_p6, %p283_p3 }
   0xf   :  { %293 = shalt.err (!%p290_p7)
}
  0x10   :  { %25 = dma.hbm_to_vmem [thread:$0]  %s407_s0, 64, %s23_s13, [#allocation3]  }
  0x11   :  { %316 = dma.done.wait [#allocation3], 64  }
  0x12   :  { %317 = vsyncadd [#allocation3], 4294967232  ;;  %vm62_vm0 = vcmask 27648   ;;  %vm64_vm1 = vcmask 3072   ;;  %v321_v0 = vmov 0.0   ;;  %vm68_vm2 = vcmask 60416  }
  0x13   :  { %63 = vst.msk [vmem:[#allocation5] sm:$0xf] %vm62_vm0, %v321_v0  ;;  %v67_v1 = vld [vmem:[%s408_s1] sm:$0x1]  ;;  %vm121_vm3 = vcmask 57344   ;;  %v96_v30 = vlaneseq }
  0x14   :  { %65 = vst.msk [vmem:[%s410_s3] sm:$0xf] %vm64_vm1, %v321_v0  ;;  %v66_v2 = vld [vmem:[#allocation2] sm:$0xf]  ;;  %vm100_vm4 = vcmp.eq.s32.totalorder %v67_v1, 0  ;;  %vm131_vm5 = vcmp.eq.s32.totalorder %v67_v1, 1 }
  0x15   :  { %v69_v3 = vsel %vm68_vm2, %v66_v2, -inf  ;;  %v253_v4 = vsel %vm100_vm4, 1.0, %v321_v0  ;;  %v256_v5 = vsel %vm131_vm5, 1.0, %v321_v0  ;;  %vm161_vm6 = vcmp.eq.s32.totalorder %v67_v1, 2 }
  0x16   :  { %v70_v6 = vrot.slane %v69_v3, 4  ;;  %v122_v7 = vsel %vm121_vm3, %v253_v4, 0.0  ;;  %v152_v9 = vsel %vm121_vm3, %v256_v5, 0.0  ;;  %v259_v10 = vsel %vm161_vm6, 1.0, %v321_v0 }
  0x17   :  { %123 = vadd.xlane.f32.xlu0 %v122_v7  ;;  %vm191_vm7 = vcmp.eq.s32.totalorder %v67_v1, 3  ;;  %v182_v13 = vsel %vm121_vm3, %v259_v10, 0.0  ;;  %v99_v33 = vshrl.u32 %v96_v30, 7 }
  0x18   :  { %v71_v8 = vmax.f32 %v69_v3, %v70_v6  ;;  %v262_v15 = vsel %vm191_vm7, 1.0, %v321_v0 }
  0x19   :  { %v212_v17 = vsel %vm121_vm3, %v262_v15, 0.0  ;;  %v112_v36 = vsub.s32 0, %v99_v33  ;;  %vm106_vm8 = vcmp.eq.s32.totalorder %v99_v33, 0  ;;  %vm137_vm9 = vcmp.eq.s32.totalorder %v99_v33, 1 }
  0x1a   :  { %v72_v11 = vrot.slane %v71_v8, 2  ;;  %v255_v55 = vsel %vm106_vm8, 1.0, %v321_v0  ;;  %v258_v56 = vsel %vm137_vm9, 1.0, %v321_v0  ;;  %vm167_vm10 = vcmp.eq.s32.totalorder %v99_v33, 2 }
  0x1b   :  { %153 = vadd.xlane.f32.xlu0 %v152_v9  ;;  %v113_v39 = vrot.slane %v253_v4, %v112_v36  ;;  %v144_v40 = vrot.slane %v256_v5, %v112_v36  ;;  %v174_v43 = vrot.slane %v259_v10, %v112_v36  ;;  %v204_v47 = vrot.slane %v262_v15, %v112_v36 }
  0x1c   :  { %v73_v12 = vmax.f32 %v71_v8, %v72_v11  ;;  %v261_v61 = vsel %vm167_vm10, 1.0, %v321_v0  ;;  %vm197_vm11 = vcmp.eq.s32.totalorder %v99_v33, 3  ;;  %v225_v8 = vld [vmem:[%s410_s3] sm:$0xf]  ;;  %v97_v11 = vand.u32 127, %v96_v30 }
  0x1d   :  { %v264_v3 = vsel %vm197_vm11, 1.0, %v321_v0 }
  0x1e   :  { %v74_v14 = vrot.slane %v73_v12, 1  ;;  %vm134_vm12 = vcmp.eq.s32.totalorder %v97_v11, 1  ;;  %vm103_vm13 = vcmp.eq.s32.totalorder %v97_v11, 0  ;;  %vm164_vm14 = vcmp.eq.s32.totalorder %v97_v11, 2 }
  0x1f   :  { %183 = vadd.xlane.f32.xlu0 %v182_v13  ;;  %v257_v13 = vsel %vm134_vm12, 1.0, %v321_v0  ;;  %v254_v15 = vsel %vm103_vm13, 1.0, %v321_v0  ;;  %vm194_vm15 = vcmp.eq.s32.totalorder %v97_v11, 3 }
  0x20   :  { %v75_v16 = vmax.f32 %v73_v12, %v74_v14 }
  0x22   :  { %v76_v18 = vsub.f32 %v66_v2, %v75_v16  ;;  %v260_v16 = vsel %vm164_vm14, 1.0, %v321_v0 }
  0x23   :  { %213 = vadd.xlane.f32.xlu0 %v212_v17 }
  0x24   :  { %v77_v19 = vmul.f32 1.442695, %v76_v18 }
  0x26   :  { %268 = vpow2.f32 %v77_v19 }
  0x30   :  { %v269_v20 = vpop.eup %268 }
  0x31   :  { %v79_v21 = vmul.f32 %v269_v20, %v269_v20 }
  0x33   :  { %v80_v22 = vsel %vm68_vm2, %v79_v21, 0.0 }
  0x34   :  { %v81_v23 = vrot.slane %v80_v22, 4 }
  0x36   :  { %v82_v24 = vadd.f32 %v81_v23, %v80_v22 }
  0x38   :  { %v83_v25 = vrot.slane %v82_v24, 2 }
  0x3a   :  { %v84_v26 = vadd.f32 %v83_v25, %v82_v24 }
  0x3c   :  { %v85_v27 = vrot.slane %v84_v26, 1 }
  0x3e   :  { %v86_v28 = vadd.f32 %v85_v27, %v84_v26  ;;  %v221_v26 = vld [vmem:[#allocation5] sm:$0xf] }
  0x40   :  { %v87_v29 = vadd.f32 1e-10, %v86_v28 }
  0x42   :  { %270 = vrcp.f32 %v87_v29 }
  0x4c   :  { %v271_v31 = vpop.eup %270 }
  0x4d   :  { %v89_v32 = vmul.f32 %v271_v31, %v87_v29 }
  0x4f   :  { %v90_v34 = vsub.f32 2.0, %v89_v32 }
  0x51   :  { %v91_v35 = vmul.f32 %v271_v31, %v90_v34 }
  0x53   :  { %v92_v37 = vmul.f32 %v91_v35, %v87_v29 }
  0x55   :  { %v93_v38 = vsub.f32 2.0, %v92_v37 }
  0x57   :  { %v94_v41 = vmul.f32 %v93_v38, %v91_v35 }
  0x59   :  { %v95_v42 = vmul.f32 %v94_v41, %v79_v21  ;;  %v263_v21 = vsel %vm194_vm15, 1.0, %v321_v0 }
  0x5b   :  { %v115_v44 = vmul.f32 %v113_v39, %v95_v42  ;;  %v146_v45 = vmul.f32 %v144_v40, %v95_v42  ;;  %v176_v49 = vmul.f32 %v174_v43, %v95_v42  ;;  %v206_v51 = vmul.f32 %v204_v47, %v95_v42 }
  0x5d   :  { %v116_v46 = vsel %vm68_vm2, %v115_v44, 0.0  ;;  %v147_v48 = vsel %vm68_vm2, %v146_v45, 0.0  ;;  %v177_v50 = vsel %vm68_vm2, %v176_v49, 0.0  ;;  %v207_v52 = vsel %vm68_vm2, %v206_v51, 0.0 }
  0x5e   :  { %117 = vadd.xlane.f32.xlu1 %v116_v46 }
  0x62   :  { %148 = vadd.xlane.f32.xlu1 %v147_v48 }
  0x66   :  { %178 = vadd.xlane.f32.xlu1 %v177_v50 }
  0x6a   :  { %208 = vadd.xlane.f32.xlu1 %v207_v52 }
  0xa4   :  { %v124_v53 = vpop.xlane.xlu0 %123 }
  0xa5   :  { %v128_v54 = vrot.slane %v124_v53, %v112_v36 }
  0xa7   :  { %v129_v58 = vmul.f32 %v255_v55, %v128_v54 }
  0xa8   :  { %v154_v57 = vpop.xlane.xlu0 %153 }
  0xa9   :  { %v158_v59 = vrot.slane %v154_v57, %v112_v36 }
  0xab   :  { %v159_v60 = vmul.f32 %v258_v56, %v158_v59 }
  0xac   :  { %v184_v62 = vpop.xlane.xlu0 %183 }
  0xad   :  { %v160_v63 = vadd.f32 %v159_v60, %v129_v58  ;;  %v188_v1 = vrot.slane %v184_v62, %v112_v36 }
  0xaf   :  { %v189_v2 = vmul.f32 %v261_v61, %v188_v1 }
  0xb0   :  { %v214_v4 = vpop.xlane.xlu0 %213 }
  0xb1   :  { %v190_v5 = vadd.f32 %v189_v2, %v160_v63  ;;  %v218_v6 = vrot.slane %v214_v4, %v112_v36 }
  0xb3   :  { %v219_v7 = vmul.f32 %v264_v3, %v218_v6 }
  0xb5   :  { %v220_v9 = vadd.f32 %v219_v7, %v190_v5 }
  0xb7   :  { %v226_v10 = vadd.f32 %v225_v8, %v220_v9 }
  0xb9   :  { %228 = vst.msk [vmem:[%s410_s3] sm:$0xf] %vm64_vm1, %v226_v10  ;;  %s322_s3 = smov [#allocation5]  }
  0xba   :  { %s235_s30 = sshll.u32 %s322_s3, 4  ;;  %s236_s30 = int_to_ptr.vmem [resolvable:$true] %s235_s30 }
  0xbb   :  { %s294_s4 = scalar_lea.vmem %s236_s30, 64  ;;  %p299_p9 = scmp.lt.s32.totalorder %s236_s30, %s236_s30 }
  0xbc   :  { %p295_p8 = scmp.ne.s32.totalorder %s236_s30, %s294_s4  ;;  %p300_p10 = scmp.lt.s32.totalorder %s294_s4, %s294_s4 }
  0xbe   :  { %p301_p11 = por %p300_p10, %p299_p9 }
  0xc0   :  { %p302_p12 = pnand %p301_p11, %p295_p8 }
  0xeb   :  { %v118_v12 = vpop.xlane.xlu1 %117 }
  0xec   :  { %v119_v19 = vmul.f32 %v254_v15, %v118_v12 }
  0xef   :  { %v149_v14 = vpop.xlane.xlu1 %148 }
  0xf0   :  { %v150_v17 = vmul.f32 %v257_v13, %v149_v14 }
  0xf2   :  { %v151_v22 = vadd.f32 %v150_v17, %v119_v19 }
  0xf3   :  { %v179_v18 = vpop.xlane.xlu1 %178 }
  0xf4   :  { %v180_v20 = vmul.f32 %v260_v16, %v179_v18 }
  0xf6   :  { %v181_v24 = vadd.f32 %v180_v20, %v151_v22 }
  0xf7   :  { %v209_v23 = vpop.xlane.xlu1 %208 }
  0xf8   :  { %v210_v25 = vmul.f32 %v263_v21, %v209_v23 }
  0xfa   :  { %v211_v27 = vadd.f32 %v210_v25, %v181_v24 }
  0xfc   :  { %v222_v28 = vadd.f32 %v221_v26, %v211_v27 }
  0xfe   :  { %224 = vst.msk [vmem:[#allocation5] sm:$0xf] %vm62_vm0, %v222_v28 }
  0xff   :  { %305 = shalt.err (!%p302_p12)
}
 0x100   :  { %s306_s7 = scalar_lea.hbm %s409_s2, 64 }
 0x101   :  { %p307_p13 = scmp.ne.s32.totalorder %s409_s2, %s306_s7  ;;  %p310_p0 = scmp.lt.u32.totalorder %s306_s7, %s409_s2 }
 0x103   :  { %p312_p1 = pnand %p310_p0, %p307_p13 }
 0x105   :  { %315 = shalt.err (!%p312_p1)
}
 0x106   :  { %238 = dma.vmem_to_hbm [thread:$0]  %s236_s30, 64, %s409_s2, [#allocation4]  }
 0x107   :  { %318 = dma.done.wait [#allocation4], 64  }
 0x108   :  { %319 = vsyncadd [#allocation4], 4294967232 }
 0x109   :  { %246 = vsyncpa [#allocation3], 1 }
 0x10a   :  { %247 = vsyncpa [#allocation4], 1 }

</bundles_post_ra>
